<compile_context>
chip_gen: v5e
topology: v5e:2x2
jax: 0.10.0
libtpu: 0.0.40
codegen_flags: <defaults>
</compile_context>

<pallas_src>
import math

import jax
import jax.numpy as jnp
import numpy as np
from jax.experimental import pallas as pl
from jax.experimental.pallas import tpu as pltpu


# -------------------------- Pallas kernel --------------------------

def _layernorm(x, gamma, beta, eps=1e-5):
    mu = jnp.mean(x, axis=-1, keepdims=True)
    d = x - mu
    var = jnp.mean(d * d, axis=-1, keepdims=True)
    return d * jax.lax.rsqrt(var + eps) * gamma + beta


def seqcls_kernel(tf_ref, vec_ref, wbig_ref, w1b_ref, out_ref):
    # tf_ref   : (N, 2)       N = Bh*S rows; col 0 = raw time, col 1 = feature scalar
    # vec_ref  : (14, D)      te_w|e_last|te_b|bq|bk|bv|bo|g1|be1|g2|be2|b2|wc^T|bc
    # wbig_ref : (4D+H, D)    rows [0:D]=wq [D:2D]=wk [2D:3D]=wv [3D:4D]=wo [4D:4D+H]=w2
    # w1b_ref  : (D+1, H)     rows 0..D-1 = w1, row D = b1
    # out_ref  : (1, Bh)      lane-dense probabilities for this grid step
    N = tf_ref.shape[0]
    D = vec_ref.shape[1]
    H = w1b_ref.shape[1]
    Bh = out_ref.shape[1]
    S = N // Bh
    scale = 1.0 / math.sqrt(D)          # single head -> head_dim == D
    f32 = jnp.float32

    vecs = vec_ref[...]
    W_te = vecs[0:2, :]                  # (2, D): [te_w_eff ; e_last]
    te_b = vecs[2:3, :]
    bq, bk, bv, bo = vecs[3:4, :], vecs[4:5, :], vecs[5:6, :], vecs[6:7, :]
    g1, be1 = vecs[7:8, :], vecs[8:9, :]
    g2, be2 = vecs[9:10, :], vecs[10:11, :]
    b2 = vecs[11:12, :]
    wcT = vecs[12:13, :]
    bc = vecs[13:14, 0:1]                # (1, 1)

    # --- time encoding + feature concat as one tiny MXU matmul (mean/std folded in) ---
    x = jnp.dot(tf_ref[...], W_te, preferred_element_type=f32) + te_b        # (N, D)

    wbig = wbig_ref[...]
    wq, wk = wbig[0 * D:1 * D, :], wbig[1 * D:2 * D, :]
    wv, wo = wbig[2 * D:3 * D, :], wbig[3 * D:4 * D, :]
    w2 = wbig[4 * D:4 * D + H, :]

    # --- self-attention (single head), separate clean-tile projections ---
    q = jnp.dot(x, wq, preferred_element_type=f32) + bq                      # (N, D)
    k = jnp.dot(x, wk, preferred_element_type=f32) + bk
    v = jnp.dot(x, wv, preferred_element_type=f32) + bv

    dn = (((1,), (1,)), ((), ()))        # contract last dims, no batch dims
    outs = []
    for b in range(Bh):                  # static unroll (Bh is small per grid step)
        lo, hi = b * S, (b + 1) * S
        qb, kb, vb = q[lo:hi], k[lo:hi], v[lo:hi]                            # (S, D)
        s = jax.lax.dot_general(qb, kb, dn, preferred_element_type=f32) * scale
        s = s - jnp.max(s, axis=-1, keepdims=True)
        p = jnp.exp(s)
        denom = jnp.sum(p, axis=-1, keepdims=True)
        r = pl.reciprocal(denom, approx=True)   # EUP slot; denom >= 1 (max-shifted softmax)
        r = r * (2.0 - denom * r)               # one Newton step -> f32-accurate
        outs.append(jnp.dot(p * r, vb, preferred_element_type=f32))          # (S, D)
    attn = outs[0] if Bh == 1 else jnp.concatenate(outs, axis=0)             # (N, D)
    attn = jnp.dot(attn, wo, preferred_element_type=f32) + bo

    h = _layernorm(x + attn, g1, be1)                                        # (N, D)

    # --- feed-forward (ReLU) ---
    w1b = w1b_ref[...]
    f1 = jnp.maximum(
        jnp.dot(h, w1b[:D, :], preferred_element_type=f32) + w1b[D:D + 1, :], 0.0)
    f2 = jnp.dot(f1, w2, preferred_element_type=f32) + b2

    h = _layernorm(h + f2, g2, be2)                                          # (N, D)

    # --- mean-pool over S + classifier + sigmoid, emitted lane-dense as (1, Bh) ---
    pooled = jnp.mean(h.reshape(Bh, S, D), axis=1)                           # (Bh, D)
    logit = jax.lax.dot_general(wcT, pooled, dn, preferred_element_type=f32) + bc  # (1, Bh)
    out_ref[...] = jax.nn.sigmoid(logit)


# -------------------------- one-time parameter packing (hoisted out of forward) -------------

def pack_params(params):
    """Fold time-normalization into the encoder weights and pack everything into 3 slabs."""
    f32 = jnp.float32
    D = params["wq"].shape[0]
    H = params["w1"].shape[1]
    Tf = params["te_w"].shape[0]
    # The module concatenates the scalar feature to the time features, so attn_dim must be
    # time_feat_dim + 1 for the last-channel trick (and for the original module's shapes).
    assert D == Tf + 1, "attn_dim must equal time_feat_dim + 1"

    te_w_eff = (params["te_w"] / params["t_std"]).astype(f32)
    te_b_eff = (params["te_b"] - params["t_mean"] * te_w_eff).astype(f32)
    te_w_row = jnp.concatenate([te_w_eff, jnp.zeros((1,), f32)])
    te_b_row = jnp.concatenate([te_b_eff, jnp.zeros((1,), f32)])
    e_last = jnp.zeros((D,), f32).at[D - 1].set(1.0)

    row = lambda a: jnp.asarray(a, f32).reshape(-1)
    bc_val = jnp.asarray(params["bc"], f32).reshape(())

    vecs = jnp.stack([
        te_w_row, e_last, te_b_row,
        row(params["bq"]), row(params["bk"]), row(params["bv"]), row(params["bo"]),
        row(params["g1"]), row(params["be1"]),
        row(params["g2"]), row(params["be2"]),
        row(params["b2"]),
        row(params["wc"]),
        jnp.broadcast_to(bc_val, (D,)),
    ], axis=0)                                                               # (14, D)

    wbig = jnp.concatenate(
        [params["wq"], params["wk"], params["wv"], params["wo"], params["w2"]],
        axis=0).astype(f32)                                                  # (4D+H, D)
    w1b = jnp.concatenate([params["w1"], params["b1"]], axis=0).astype(f32)  # (D+1, H)

    return {"vecs": vecs, "wbig": wbig, "w1b": w1b}


# -------------------------- forward wrapper --------------------------

def seqcls_forward(times, features, packed):
    """times: (B, S) f32, features: (B, S) f32, packed: from pack_params -> (B, 1) probs."""
    B, S = times.shape
    f32 = jnp.float32

    # Single grid step by default (the kernel is overhead-bound at small shapes and
    # v5e/v6e have a single TensorCore). Only split 2-way (v7x dual-TC) when each half
    # carries enough rows to amortize the step overhead + duplicated weight DMA.
    rows_per_half = (B // 2) * S
    G = 2 if (B % 2 == 0 and rows_per_half >= 512 and rows_per_half % 8 == 0) else 1
    Bh = B // G
    N = Bh * S

    # Per-call prologue is only this tiny stack; all weight packing is done once offline.
    tf = jnp.stack([times.reshape(B * S), features.reshape(B * S)], axis=1).astype(f32)

    vecs, wbig, w1b = packed["vecs"], packed["wbig"], packed["w1b"]

    out = pl.pallas_call(
        seqcls_kernel,
        out_shape=jax.ShapeDtypeStruct((G, Bh), jnp.float32),
        grid=(G,),
        in_specs=[
            pl.BlockSpec((N, 2), lambda g: (g, 0)),
            pl.BlockSpec(vecs.shape, lambda g: (0, 0)),
            pl.BlockSpec(wbig.shape, lambda g: (0, 0)),
            pl.BlockSpec(w1b.shape, lambda g: (0, 0)),
        ],
        out_specs=pl.BlockSpec((1, Bh), lambda g: (g, 0)),
        compiler_params=pltpu.CompilerParams(dimension_semantics=("parallel",)),
    )(tf, vecs, wbig, w1b)
    return out.reshape(B, 1)


# -------------------------- reference (plain JAX, for verification) --------------------------

def ref_forward(times, features, params):
    t_norm = (times - params["t_mean"]) / params["t_std"]
    time_feat = t_norm[..., None] * params["te_w"] + params["te_b"]
    x = jnp.concatenate([time_feat, features[..., None]], axis=-1).astype(jnp.float32)
    D = x.shape[-1]
    scale = 1.0 / math.sqrt(D)

    q = jnp.einsum("bsd,de->bse", x, params["wq"]) + params["bq"]
    k = jnp.einsum("bsd,de->bse", x, params["wk"]) + params["bk"]
    v = jnp.einsum("bsd,de->bse", x, params["wv"]) + params["bv"]
    s = jnp.einsum("bqd,bkd->bqk", q, k) * scale
    p = jax.nn.softmax(s, axis=-1)
    attn = jnp.einsum("bqk,bkd->bqd", p, v)
    attn = jnp.einsum("bsd,de->bse", attn, params["wo"]) + params["bo"]

    def ln(z, g, b, eps=1e-5):
        mu = jnp.mean(z, axis=-1, keepdims=True)
        var = jnp.mean((z - mu) ** 2, axis=-1, keepdims=True)
        return (z - mu) * jax.lax.rsqrt(var + eps) * g + b

    h = ln(x + attn, params["g1"], params["be1"])
    f = jax.nn.relu(jnp.einsum("bsd,dh->bsh", h, params["w1"]) + params["b1"])
    f = jnp.einsum("bsh,hd->bsd", f, params["w2"]) + params["b2"]
    h = ln(h + f, params["g2"], params["be2"])

    pooled = jnp.mean(h, axis=1)                                             # (B, D)
    logit = pooled @ params["wc"] + params["bc"]                             # (B, 1)
    return jax.nn.sigmoid(logit)


# -------------------------- param init --------------------------

def init_params(key, time_feat_dim, attn_dim):
    D = attn_dim
    H = 4 * D
    ks = jax.random.split(key, 12)
    n = lambda k, shape, s=0.1: (jax.random.normal(k, shape, jnp.float32) * s)
    params = {
        "t_mean": jnp.float32(0.0),
        "t_std": jnp.float32(1.0),
        "te_w": n(ks[0], (time_feat_dim,)),
        "te_b": n(ks[1], (time_feat_dim,)),
        "wq": n(ks[2], (D, D)), "bq": n(ks[3], (1, D)),
        "wk": n(ks[4], (D, D)), "bk": n(ks[5], (1, D)),
        "wv": n(ks[6], (D, D)), "bv": n(ks[7], (1, D)),
        "wo": n(ks[8], (D, D)), "bo": jnp.zeros((1, D), jnp.float32),
        "g1": jnp.ones((1, D), jnp.float32), "be1": jnp.zeros((1, D), jnp.float32),
        "w1": n(ks[9], (D, H)), "b1": jnp.zeros((1, H), jnp.float32),
        "w2": n(ks[10], (H, D)), "b2": jnp.zeros((1, D), jnp.float32),
        "g2": jnp.ones((1, D), jnp.float32), "be2": jnp.zeros((1, D), jnp.float32),
        "wc": n(ks[11], (D, 1)), "bc": jnp.zeros((1, 1), jnp.float32),
    }
    return params


# -------------------------- main --------------------------

if __name__ == "__main__":
    B, S = 2, 8
    time_feat_dim = 31
    attn_dim = time_feat_dim + 1   # 32 (feature scalar concatenated as the last channel)

    key = jax.random.PRNGKey(0)
    k_t, k_f, k_p = jax.random.split(key, 3)
    times = jax.random.uniform(k_t, (B, S), jnp.float32, 0.0, 5.0)
    features = jax.random.normal(k_f, (B, S), jnp.float32)
    params = init_params(k_p, time_feat_dim, attn_dim)

    packed = jax.tree_util.tree_map(jax.block_until_ready, pack_params(params))  # once, offline
    fwd = jax.jit(seqcls_forward)

    out = jax.block_until_ready(fwd(times, features, packed))
    ref = jax.block_until_ready(ref_forward(times, features, params))
    np.testing.assert_allclose(np.asarray(out), np.asarray(ref), rtol=1e-4, atol=1e-4)

    print("KERNEL_OK")
</pallas_src>

<mosaic_0001>
module attributes {stable_mosaic.version = 11 : i64} {
  func.func @seqcls_kernel(%arg0: i32, %arg1: memref<16x2xf32, #tpu.memory_space<vmem>>, %arg2: memref<14x32xf32, #tpu.memory_space<vmem>>, %arg3: memref<256x32xf32, #tpu.memory_space<vmem>>, %arg4: memref<33x128xf32, #tpu.memory_space<vmem>>, %arg5: memref<1x2xf32, #tpu.memory_space<vmem>>) attributes {dimension_semantics = [#tpu.dimension_semantics<parallel>], iteration_bounds = array<i64: 1>, scalar_prefetch = 0 : i64, scratch_operands = 0 : i64, tpu.core_type = #tpu.core_type<tc>, window_params = [{transform_indices = @transform_0, window_bounds = array<i64: 16, 2>}, {pipeline_mode = #tpu.pipeline_mode<synchronous>, transform_indices = @transform_1, window_bounds = array<i64: 14, 32>}, {pipeline_mode = #tpu.pipeline_mode<synchronous>, transform_indices = @transform_2, window_bounds = array<i64: 256, 32>}, {pipeline_mode = #tpu.pipeline_mode<synchronous>, transform_indices = @transform_3, window_bounds = array<i64: 33, 128>}, {transform_indices = @transform_4, window_bounds = array<i64: 1, 2>}]} {
    %c0 = arith.constant 0 : index
    %c0_0 = arith.constant 0 : index
    %0 = vector.load %arg2[%c0, %c0_0] : memref<14x32xf32, #tpu.memory_space<vmem>>, vector<14x32xf32>
    %1 = vector.extract_strided_slice %0 {offsets = [0, 0], sizes = [2, 32], strides = [1, 1]} : vector<14x32xf32> to vector<2x32xf32>
    %2 = vector.extract_strided_slice %0 {offsets = [2, 0], sizes = [1, 32], strides = [1, 1]} : vector<14x32xf32> to vector<1x32xf32>
    %3 = vector.extract_strided_slice %0 {offsets = [3, 0], sizes = [1, 32], strides = [1, 1]} : vector<14x32xf32> to vector<1x32xf32>
    %4 = vector.extract_strided_slice %0 {offsets = [4, 0], sizes = [1, 32], strides = [1, 1]} : vector<14x32xf32> to vector<1x32xf32>
    %5 = vector.extract_strided_slice %0 {offsets = [5, 0], sizes = [1, 32], strides = [1, 1]} : vector<14x32xf32> to vector<1x32xf32>
    %6 = vector.extract_strided_slice %0 {offsets = [6, 0], sizes = [1, 32], strides = [1, 1]} : vector<14x32xf32> to vector<1x32xf32>
    %7 = vector.extract_strided_slice %0 {offsets = [7, 0], sizes = [1, 32], strides = [1, 1]} : vector<14x32xf32> to vector<1x32xf32>
    %8 = vector.extract_strided_slice %0 {offsets = [8, 0], sizes = [1, 32], strides = [1, 1]} : vector<14x32xf32> to vector<1x32xf32>
    %9 = vector.extract_strided_slice %0 {offsets = [9, 0], sizes = [1, 32], strides = [1, 1]} : vector<14x32xf32> to vector<1x32xf32>
    %10 = vector.extract_strided_slice %0 {offsets = [10, 0], sizes = [1, 32], strides = [1, 1]} : vector<14x32xf32> to vector<1x32xf32>
    %11 = vector.extract_strided_slice %0 {offsets = [11, 0], sizes = [1, 32], strides = [1, 1]} : vector<14x32xf32> to vector<1x32xf32>
    %12 = vector.extract_strided_slice %0 {offsets = [12, 0], sizes = [1, 32], strides = [1, 1]} : vector<14x32xf32> to vector<1x32xf32>
    %13 = vector.extract_strided_slice %0 {offsets = [13, 0], sizes = [1, 1], strides = [1, 1]} : vector<14x32xf32> to vector<1x1xf32>
    %c0_1 = arith.constant 0 : index
    %c0_2 = arith.constant 0 : index
    %14 = vector.load %arg1[%c0_1, %c0_2] : memref<16x2xf32, #tpu.memory_space<vmem>>, vector<16x2xf32>
    %cst = arith.constant dense<0.000000e+00> : vector<16x32xf32>
    %15 = tpu.matmul %14, %1, %cst {dimension_numbers = #tpu.dot_dimension_numbers<[1], [0], [0], [1], [0, 0, 1, 1], [], []>} : vector<16x2xf32>, vector<2x32xf32>, vector<16x32xf32> -> vector<16x32xf32>
    %16 = vector.broadcast %2 : vector<1x32xf32> to vector<16x32xf32>
    %17 = arith.addf %15, %16 : vector<16x32xf32>
    %c0_3 = arith.constant 0 : index
    %c0_4 = arith.constant 0 : index
    %18 = vector.load %arg3[%c0_3, %c0_4] : memref<256x32xf32, #tpu.memory_space<vmem>>, vector<256x32xf32>
    %19 = vector.extract_strided_slice %18 {offsets = [0, 0], sizes = [32, 32], strides = [1, 1]} : vector<256x32xf32> to vector<32x32xf32>
    %20 = vector.extract_strided_slice %18 {offsets = [32, 0], sizes = [32, 32], strides = [1, 1]} : vector<256x32xf32> to vector<32x32xf32>
    %21 = vector.extract_strided_slice %18 {offsets = [64, 0], sizes = [32, 32], strides = [1, 1]} : vector<256x32xf32> to vector<32x32xf32>
    %22 = vector.extract_strided_slice %18 {offsets = [96, 0], sizes = [32, 32], strides = [1, 1]} : vector<256x32xf32> to vector<32x32xf32>
    %23 = vector.extract_strided_slice %18 {offsets = [128, 0], sizes = [128, 32], strides = [1, 1]} : vector<256x32xf32> to vector<128x32xf32>
    %cst_5 = arith.constant dense<0.000000e+00> : vector<16x32xf32>
    %24 = tpu.matmul %17, %19, %cst_5 {dimension_numbers = #tpu.dot_dimension_numbers<[1], [0], [0], [1], [0, 0, 1, 1], [], []>} : vector<16x32xf32>, vector<32x32xf32>, vector<16x32xf32> -> vector<16x32xf32>
    %25 = vector.broadcast %3 : vector<1x32xf32> to vector<16x32xf32>
    %26 = arith.addf %24, %25 : vector<16x32xf32>
    %cst_6 = arith.constant dense<0.000000e+00> : vector<16x32xf32>
    %27 = tpu.matmul %17, %20, %cst_6 {dimension_numbers = #tpu.dot_dimension_numbers<[1], [0], [0], [1], [0, 0, 1, 1], [], []>} : vector<16x32xf32>, vector<32x32xf32>, vector<16x32xf32> -> vector<16x32xf32>
    %28 = vector.broadcast %4 : vector<1x32xf32> to vector<16x32xf32>
    %29 = arith.addf %27, %28 : vector<16x32xf32>
    %cst_7 = arith.constant dense<0.000000e+00> : vector<16x32xf32>
    %30 = tpu.matmul %17, %21, %cst_7 {dimension_numbers = #tpu.dot_dimension_numbers<[1], [0], [0], [1], [0, 0, 1, 1], [], []>} : vector<16x32xf32>, vector<32x32xf32>, vector<16x32xf32> -> vector<16x32xf32>
    %31 = vector.broadcast %5 : vector<1x32xf32> to vector<16x32xf32>
    %32 = arith.addf %30, %31 : vector<16x32xf32>
    %33 = vector.extract_strided_slice %26 {offsets = [0, 0], sizes = [8, 32], strides = [1, 1]} : vector<16x32xf32> to vector<8x32xf32>
    %34 = vector.extract_strided_slice %29 {offsets = [0, 0], sizes = [8, 32], strides = [1, 1]} : vector<16x32xf32> to vector<8x32xf32>
    %35 = vector.extract_strided_slice %32 {offsets = [0, 0], sizes = [8, 32], strides = [1, 1]} : vector<16x32xf32> to vector<8x32xf32>
    %cst_8 = arith.constant dense<0.000000e+00> : vector<8x8xf32>
    %36 = tpu.matmul %33, %34, %cst_8 {dimension_numbers = #tpu.dot_dimension_numbers<[1], [1], [0], [0], [0, 0, 1, 0], [], []>} : vector<8x32xf32>, vector<8x32xf32>, vector<8x8xf32> -> vector<8x8xf32>
    %cst_9 = arith.constant 0.176776692 : f32
    %37 = vector.broadcast %cst_9 : f32 to vector<8x8xf32>
    %38 = arith.mulf %36, %37 : vector<8x8xf32>
    %cst_10 = arith.constant dense<0xFF800000> : vector<8xf32>
    %39 = vector.multi_reduction <maximumf>, %38, %cst_10 [1] : vector<8x8xf32> to vector<8xf32>
    %40 = vector.shape_cast %39 : vector<8xf32> to vector<8x1xf32>
    %41 = vector.broadcast %40 : vector<8x1xf32> to vector<8x8xf32>
    %42 = arith.subf %38, %41 : vector<8x8xf32>
    %43 = math.exp %42 : vector<8x8xf32>
    %cst_11 = arith.constant dense<0.000000e+00> : vector<8xf32>
    %44 = vector.multi_reduction <add>, %43, %cst_11 [1] : vector<8x8xf32> to vector<8xf32>
    %45 = vector.shape_cast %44 : vector<8xf32> to vector<8x1xf32>
    %46 = tpu.reciprocal %45 {approx = true} : vector<8x1xf32> -> vector<8x1xf32>
    %47 = arith.mulf %45, %46 : vector<8x1xf32>
    %cst_12 = arith.constant 2.000000e+00 : f32
    %48 = vector.broadcast %cst_12 : f32 to vector<8x1xf32>
    %49 = arith.subf %48, %47 : vector<8x1xf32>
    %50 = arith.mulf %46, %49 : vector<8x1xf32>
    %51 = vector.broadcast %50 : vector<8x1xf32> to vector<8x8xf32>
    %52 = arith.mulf %43, %51 : vector<8x8xf32>
    %cst_13 = arith.constant dense<0.000000e+00> : vector<8x32xf32>
    %53 = tpu.matmul %52, %35, %cst_13 {dimension_numbers = #tpu.dot_dimension_numbers<[1], [0], [0], [1], [0, 0, 1, 1], [], []>} : vector<8x8xf32>, vector<8x32xf32>, vector<8x32xf32> -> vector<8x32xf32>
    %54 = vector.extract_strided_slice %26 {offsets = [8, 0], sizes = [8, 32], strides = [1, 1]} : vector<16x32xf32> to vector<8x32xf32>
    %55 = vector.extract_strided_slice %29 {offsets = [8, 0], sizes = [8, 32], strides = [1, 1]} : vector<16x32xf32> to vector<8x32xf32>
    %56 = vector.extract_strided_slice %32 {offsets = [8, 0], sizes = [8, 32], strides = [1, 1]} : vector<16x32xf32> to vector<8x32xf32>
    %cst_14 = arith.constant dense<0.000000e+00> : vector<8x8xf32>
    %57 = tpu.matmul %54, %55, %cst_14 {dimension_numbers = #tpu.dot_dimension_numbers<[1], [1], [0], [0], [0, 0, 1, 0], [], []>} : vector<8x32xf32>, vector<8x32xf32>, vector<8x8xf32> -> vector<8x8xf32>
    %cst_15 = arith.constant 0.176776692 : f32
    %58 = vector.broadcast %cst_15 : f32 to vector<8x8xf32>
    %59 = arith.mulf %57, %58 : vector<8x8xf32>
    %cst_16 = arith.constant dense<0xFF800000> : vector<8xf32>
    %60 = vector.multi_reduction <maximumf>, %59, %cst_16 [1] : vector<8x8xf32> to vector<8xf32>
    %61 = vector.shape_cast %60 : vector<8xf32> to vector<8x1xf32>
    %62 = vector.broadcast %61 : vector<8x1xf32> to vector<8x8xf32>
    %63 = arith.subf %59, %62 : vector<8x8xf32>
    %64 = math.exp %63 : vector<8x8xf32>
    %cst_17 = arith.constant dense<0.000000e+00> : vector<8xf32>
    %65 = vector.multi_reduction <add>, %64, %cst_17 [1] : vector<8x8xf32> to vector<8xf32>
    %66 = vector.shape_cast %65 : vector<8xf32> to vector<8x1xf32>
    %67 = tpu.reciprocal %66 {approx = true} : vector<8x1xf32> -> vector<8x1xf32>
    %68 = arith.mulf %66, %67 : vector<8x1xf32>
    %cst_18 = arith.constant 2.000000e+00 : f32
    %69 = vector.broadcast %cst_18 : f32 to vector<8x1xf32>
    %70 = arith.subf %69, %68 : vector<8x1xf32>
    %71 = arith.mulf %67, %70 : vector<8x1xf32>
    %72 = vector.broadcast %71 : vector<8x1xf32> to vector<8x8xf32>
    %73 = arith.mulf %64, %72 : vector<8x8xf32>
    %cst_19 = arith.constant dense<0.000000e+00> : vector<8x32xf32>
    %74 = tpu.matmul %73, %56, %cst_19 {dimension_numbers = #tpu.dot_dimension_numbers<[1], [0], [0], [1], [0, 0, 1, 1], [], []>} : vector<8x8xf32>, vector<8x32xf32>, vector<8x32xf32> -> vector<8x32xf32>
    %75 = tpu.concatenate %53, %74 in 0 : vector<8x32xf32>, vector<8x32xf32> -> vector<16x32xf32>
    %cst_20 = arith.constant dense<0.000000e+00> : vector<16x32xf32>
    %76 = tpu.matmul %75, %22, %cst_20 {dimension_numbers = #tpu.dot_dimension_numbers<[1], [0], [0], [1], [0, 0, 1, 1], [], []>} : vector<16x32xf32>, vector<32x32xf32>, vector<16x32xf32> -> vector<16x32xf32>
    %77 = vector.broadcast %6 : vector<1x32xf32> to vector<16x32xf32>
    %78 = arith.addf %76, %77 : vector<16x32xf32>
    %79 = arith.addf %17, %78 : vector<16x32xf32>
    %cst_21 = arith.constant dense<0.000000e+00> : vector<16xf32>
    %80 = vector.multi_reduction <add>, %79, %cst_21 [1] : vector<16x32xf32> to vector<16xf32>
    %81 = vector.shape_cast %80 : vector<16xf32> to vector<16x1xf32>
    %cst_22 = arith.constant 3.200000e+01 : f32
    %82 = vector.broadcast %cst_22 : f32 to vector<16x1xf32>
    %83 = arith.divf %81, %82 : vector<16x1xf32>
    %84 = vector.broadcast %83 : vector<16x1xf32> to vector<16x32xf32>
    %85 = arith.subf %79, %84 : vector<16x32xf32>
    %86 = arith.mulf %85, %85 : vector<16x32xf32>
    %cst_23 = arith.constant dense<0.000000e+00> : vector<16xf32>
    %87 = vector.multi_reduction <add>, %86, %cst_23 [1] : vector<16x32xf32> to vector<16xf32>
    %88 = vector.shape_cast %87 : vector<16xf32> to vector<16x1xf32>
    %cst_24 = arith.constant 3.200000e+01 : f32
    %89 = vector.broadcast %cst_24 : f32 to vector<16x1xf32>
    %90 = arith.divf %88, %89 : vector<16x1xf32>
    %cst_25 = arith.constant 9.99999974E-6 : f32
    %91 = vector.broadcast %cst_25 : f32 to vector<16x1xf32>
    %92 = arith.addf %90, %91 : vector<16x1xf32>
    %93 = math.rsqrt %92 : vector<16x1xf32>
    %94 = vector.broadcast %93 : vector<16x1xf32> to vector<16x32xf32>
    %95 = arith.mulf %85, %94 : vector<16x32xf32>
    %96 = vector.broadcast %7 : vector<1x32xf32> to vector<16x32xf32>
    %97 = arith.mulf %95, %96 : vector<16x32xf32>
    %98 = vector.broadcast %8 : vector<1x32xf32> to vector<16x32xf32>
    %99 = arith.addf %97, %98 : vector<16x32xf32>
    %c0_26 = arith.constant 0 : index
    %c0_27 = arith.constant 0 : index
    %100 = vector.load %arg4[%c0_26, %c0_27] : memref<33x128xf32, #tpu.memory_space<vmem>>, vector<33x128xf32>
    %101 = vector.extract_strided_slice %100 {offsets = [0, 0], sizes = [32, 128], strides = [1, 1]} : vector<33x128xf32> to vector<32x128xf32>
    %cst_28 = arith.constant dense<0.000000e+00> : vector<16x128xf32>
    %102 = tpu.matmul %99, %101, %cst_28 {dimension_numbers = #tpu.dot_dimension_numbers<[1], [0], [0], [1], [0, 0, 1, 1], [], []>} : vector<16x32xf32>, vector<32x128xf32>, vector<16x128xf32> -> vector<16x128xf32>
    %103 = vector.extract_strided_slice %100 {offsets = [32, 0], sizes = [1, 128], strides = [1, 1]} : vector<33x128xf32> to vector<1x128xf32>
    %104 = vector.broadcast %103 : vector<1x128xf32> to vector<16x128xf32>
    %105 = arith.addf %102, %104 : vector<16x128xf32>
    %cst_29 = arith.constant 0.000000e+00 : f32
    %106 = vector.broadcast %cst_29 : f32 to vector<16x128xf32>
    %107 = arith.maximumf %105, %106 : vector<16x128xf32>
    %cst_30 = arith.constant dense<0.000000e+00> : vector<16x32xf32>
    %108 = tpu.matmul %107, %23, %cst_30 {dimension_numbers = #tpu.dot_dimension_numbers<[1], [0], [0], [1], [0, 0, 1, 1], [], []>} : vector<16x128xf32>, vector<128x32xf32>, vector<16x32xf32> -> vector<16x32xf32>
    %109 = vector.broadcast %11 : vector<1x32xf32> to vector<16x32xf32>
    %110 = arith.addf %108, %109 : vector<16x32xf32>
    %111 = arith.addf %99, %110 : vector<16x32xf32>
    %cst_31 = arith.constant dense<0.000000e+00> : vector<16xf32>
    %112 = vector.multi_reduction <add>, %111, %cst_31 [1] : vector<16x32xf32> to vector<16xf32>
    %113 = vector.shape_cast %112 : vector<16xf32> to vector<16x1xf32>
    %cst_32 = arith.constant 3.200000e+01 : f32
    %114 = vector.broadcast %cst_32 : f32 to vector<16x1xf32>
    %115 = arith.divf %113, %114 : vector<16x1xf32>
    %116 = vector.broadcast %115 : vector<16x1xf32> to vector<16x32xf32>
    %117 = arith.subf %111, %116 : vector<16x32xf32>
    %118 = arith.mulf %117, %117 : vector<16x32xf32>
    %cst_33 = arith.constant dense<0.000000e+00> : vector<16xf32>
    %119 = vector.multi_reduction <add>, %118, %cst_33 [1] : vector<16x32xf32> to vector<16xf32>
    %120 = vector.shape_cast %119 : vector<16xf32> to vector<16x1xf32>
    %cst_34 = arith.constant 3.200000e+01 : f32
    %121 = vector.broadcast %cst_34 : f32 to vector<16x1xf32>
    %122 = arith.divf %120, %121 : vector<16x1xf32>
    %cst_35 = arith.constant 9.99999974E-6 : f32
    %123 = vector.broadcast %cst_35 : f32 to vector<16x1xf32>
    %124 = arith.addf %122, %123 : vector<16x1xf32>
    %125 = math.rsqrt %124 : vector<16x1xf32>
    %126 = vector.broadcast %125 : vector<16x1xf32> to vector<16x32xf32>
    %127 = arith.mulf %117, %126 : vector<16x32xf32>
    %128 = vector.broadcast %9 : vector<1x32xf32> to vector<16x32xf32>
    %129 = arith.mulf %127, %128 : vector<16x32xf32>
    %130 = vector.broadcast %10 : vector<1x32xf32> to vector<16x32xf32>
    %131 = arith.addf %129, %130 : vector<16x32xf32>
    %132 = vector.shape_cast %131 : vector<16x32xf32> to vector<2x8x32xf32>
    %cst_36 = arith.constant dense<0.000000e+00> : vector<2x32xf32>
    %133 = vector.multi_reduction <add>, %132, %cst_36 [1] : vector<2x8x32xf32> to vector<2x32xf32>
    %cst_37 = arith.constant 8.000000e+00 : f32
    %134 = vector.broadcast %cst_37 : f32 to vector<2x32xf32>
    %135 = arith.divf %133, %134 : vector<2x32xf32>
    %cst_38 = arith.constant dense<0.000000e+00> : vector<1x2xf32>
    %136 = tpu.matmul %12, %135, %cst_38 {dimension_numbers = #tpu.dot_dimension_numbers<[1], [1], [0], [0], [0, 0, 1, 0], [], []>} : vector<1x32xf32>, vector<2x32xf32>, vector<1x2xf32> -> vector<1x2xf32>
    %137 = vector.broadcast %13 : vector<1x1xf32> to vector<1x2xf32>
    %138 = arith.addf %136, %137 : vector<1x2xf32>
    %139 = arith.negf %138 : vector<1x2xf32>
    %140 = math.exp %139 : vector<1x2xf32>
    %cst_39 = arith.constant 1.000000e+00 : f32
    %141 = vector.broadcast %cst_39 : f32 to vector<1x2xf32>
    %142 = arith.addf %141, %140 : vector<1x2xf32>
    %143 = arith.divf %141, %142 : vector<1x2xf32>
    %c0_40 = arith.constant 0 : index
    %c0_41 = arith.constant 0 : index
    %144 = vector.load %arg5[%c0_40, %c0_41] : memref<1x2xf32, #tpu.memory_space<vmem>>, vector<1x2xf32>
    tpu.vector_store %arg5[%c0_40, %c0_41], %143 {strides = array<i32>} : memref<1x2xf32, #tpu.memory_space<vmem>>, vector<1x2xf32>,
    return
  }
  func.func @transform_0(%arg0: i32) -> (i32, i32) {
    %c0_i32 = arith.constant 0 : i32
    %c0_i32_0 = arith.constant 0 : i32
    return %arg0, %c0_i32 : i32, i32
  }
  func.func @transform_1(%arg0: i32) -> (i32, i32) {
    %c0_i32 = arith.constant 0 : i32
    %c0_i32_0 = arith.constant 0 : i32
    %c0_i32_1 = arith.constant 0 : i32
    return %c0_i32, %c0_i32_0 : i32, i32
  }
  func.func @transform_2(%arg0: i32) -> (i32, i32) {
    %c0_i32 = arith.constant 0 : i32
    %c0_i32_0 = arith.constant 0 : i32
    %c0_i32_1 = arith.constant 0 : i32
    return %c0_i32, %c0_i32_0 : i32, i32
  }
  func.func @transform_3(%arg0: i32) -> (i32, i32) {
    %c0_i32 = arith.constant 0 : i32
    %c0_i32_0 = arith.constant 0 : i32
    %c0_i32_1 = arith.constant 0 : i32
    return %c0_i32, %c0_i32_0 : i32, i32
  }
  func.func @transform_4(%arg0: i32) -> (i32, i32) {
    %c0_i32 = arith.constant 0 : i32
    %c0_i32_0 = arith.constant 0 : i32
    return %arg0, %c0_i32 : i32, i32
  }
}

</mosaic_0001>

<bundles_post_ra>
// kernel: seqcls_forward.1
= control target key start
LH: loop header
LB: loop body
LE: loop exit
PB: predicated region body
PF: predicated region fallthrough
CT: control target
= control target key end

     0   :  { %vm30_vm0 = vcmask 1041408   ;;  %vm23_vm1 = vcmask 15360   ;;  %s907_s0 = inlined_call_operand.vmem [shape: f32[16,2], index: 0, kind: input, shape index: {}]   ;;  %s908_s1 = inlined_call_operand.vmem [shape: f32[14,32], index: 1, kind: input, shape index: {}]   ;;  %s909_s2 = inlined_call_operand.vmem [shape: f32[256,32], index: 2, kind: input, shape index: {}]   ;;  %s910_s3 = inlined_call_operand.vmem [shape: f32[33,128], index: 3, kind: input, shape index: {}]   ;;  %s911_s4 = inlined_call_operand.hbm [shape: f32[1,2], index: 4, kind: output, shape index: {}]  }
   0x1   :  { %v708_v0 = vld [vmem:[%s908_s1] sm:$0xff]  ;;  %v60_v2 = vld [vmem:[%s909_s2 + $0x18] sm:$0xff]  ;;  %v59_v4 = vld [vmem:[%s909_s2 + $0x10] sm:$0xff] }
   0x2   :  { %v20_v1 = vld [vmem:[%s907_s0] sm:$0xff]  ;;  %594 = vmatpush.msk.msra.mxu0 %vm30_vm0, %v708_v0  ;;  %v64_v3 = vld [vmem:[%s909_s2 + $0x38] sm:$0xff]  ;;  %109 = vmatpush.msra.mxu1 %v60_v2  ;;  %v63_v5 = vld [vmem:[%s909_s2 + $0x30] sm:$0xff] }
   0x3   :  { %595 = vmatmul.msk.f32.vlgmr.msra.gmra.mxu0 %vm23_vm1, %v20_v1 }
   0x4   :  { %9 = vsyncpa [#allocation3], 0  ;;  %133 = vmatpush.msrb.mxu0 %v64_v3  ;;  %616 = vmatpush.msra.mxu3 %v64_v3  ;;  %v21_v6 = vld [vmem:[%s907_s0 + $0x8] sm:$0xff]  ;;  %v57_v9 = vld [vmem:[%s909_s2] sm:$0xff]  ;;  %v22_v15 = vperm.slane %v708_v0, 2  ;;  %vm90_vm2 = vcmask 261120  }
   0x5   :  { %110 = vmatpush.msra.mxu1 %v59_v4  ;;  %v58_v7 = vld [vmem:[%s909_s2 + $0x8] sm:$0xff]  ;;  %v61_v10 = vld [vmem:[%s909_s2 + $0x20] sm:$0xff]  ;;  %v68_v11 = vld [vmem:[%s909_s2 + $0x58] sm:$0xff]  ;;  %v120_v20 = vperm.slane %v708_v0, 4  ;;  %v89_v21 = vperm.slane %v708_v0, 3  ;;  %v144_v30 = vperm.slane %v708_v0, 5 }
   0x6   :  { %134 = vmatpush.msrb.mxu0 %v63_v5  ;;  %617 = vmatpush.msra.mxu3 %v63_v5  ;;  %v62_v8 = vld [vmem:[%s909_s2 + $0x28] sm:$0xff]  ;;  %v67_v12 = vld [vmem:[%s909_s2 + $0x50] sm:$0xff]  ;;  %v65_v14 = vld [vmem:[%s909_s2 + $0x40] sm:$0xff]  ;;  %vm195_vm3 = vcmask 64512   ;;  %s585_s16 = sshll.u32 %s911_s4, 4  ;;  %s586_s16 = int_to_ptr.hbm [resolvable:$true] %s585_s16 }
   0x7   :  { %111 = vmatpush.msra.mxu1 %v58_v7  ;;  %v66_v13 = vld [vmem:[%s909_s2 + $0x48] sm:$0xff]  ;;  %v72_v52 = vld [vmem:[%s909_s2 + $0x78] sm:$0xff]  ;;  %v71_v53 = vld [vmem:[%s909_s2 + $0x70] sm:$0xff] }
   0x8   :  { %135 = vmatpush.msrb.mxu0 %v62_v8  ;;  %618 = vmatpush.msra.mxu3 %v62_v8  ;;  %v70_v54 = vld [vmem:[%s909_s2 + $0x68] sm:$0xff]  ;;  %v69_v3 = vld [vmem:[%s909_s2 + $0x60] sm:$0xff] }
   0x9   :  { %112 = vmatpush.msra.mxu1 %v57_v9 }
   0xa   :  { %136 = vmatpush.msrb.mxu0 %v61_v10  ;;  %619 = vmatpush.msra.mxu3 %v61_v10 }
   0xb   :  { %596 = vmatmul.msk.f32.gmra.mxu0 %vm23_vm1, %v21_v6  ;;  %v297_v6 = vperm.slane %v708_v0, 6 }
   0xc   :  { %157 = vmatpush.msrb.mxu3 %v68_v11 }
   0xe   :  { %158 = vmatpush.msrb.mxu3 %v67_v12 }
  0x10   :  { %159 = vmatpush.msrb.mxu3 %v66_v13 }
  0x12   :  { %160 = vmatpush.msrb.mxu3 %v65_v14 }
  0x80   :  { %v51_v16 = vpop.f32.mrf.mxu0 }
  0x81   :  { %v754_v17 = vadd.f32 %v51_v16, %v22_v15 }
  0x83   :  { %597 = vmatmul.msk.f32.vlgmr.msra.gmra.mxu1 %vm90_vm2, %v754_v17  ;;  %599 = vmatmul.msk.f32.vlgmr.msrb.gmra.mxu0 %vm90_vm2, %v754_v17 }
  0x88   :  { %v54_v18 = vpop.f32.mrf.mxu0 }
  0x89   :  { %v760_v19 = vadd.f32 %v54_v18, %v22_v15  ;;  %v676_v15 = vmov 32.0  }
  0x8b   :  { %598 = vmatmul.msk.f32.gmra.mxu1 %vm90_vm2, %v760_v19  ;;  %600 = vmatmul.msk.f32.vlgmr.msra.gmra.mxu3 %vm90_vm2, %v760_v19 }
  0x93   :  { %601 = vmatmul.msk.f32.vlgmr.msrb.gmra.mxu3 %vm90_vm2, %v754_v17 }
  0x9b   :  { %602 = vmatmul.msk.f32.gmra.mxu3 %vm90_vm2, %v760_v19 }
 0x100   :  { %v138_v22 = vpop.f32.mrf.mxu0  ;;  %v114_v23 = vpop.f32.mrf.mxu1 }
 0x101   :  { %v139_v24 = vadd.f32 %v138_v22, %v120_v20  ;;  %v115_v25 = vadd.f32 %v114_v23, %v89_v21 }
 0x103   :  { %603 = vmatpush.xpose.msk.msra.mxu0 %vm90_vm2, %v139_v24 }
 0x106   :  { %604 = vmatmul.msk.f32.vlgmr.msra.gmra.mxu0 %vm90_vm2, %v115_v25 }
 0x107   :  { %316 = vmatpush.msrb.mxu0 %v72_v52 }
 0x108   :  { %v117_v27 = vpop.f32.mrf.mxu1 }
 0x109   :  { %v118_v29 = vadd.f32 %v117_v27, %v89_v21  ;;  %317 = vmatpush.msrb.mxu0 %v71_v53  ;;  %v86_v53 = vld [vmem:[%s909_s2 + $0xe8] sm:$0xff] }
 0x10b   :  { %318 = vmatpush.msrb.mxu0 %v70_v54 }
 0x10d   :  { %319 = vmatpush.msrb.mxu0 %v69_v3 }
 0x10e   :  { %v141_v26 = vpop.f32.mrf.mxu3 }
 0x10f   :  { %v142_v28 = vadd.f32 %v141_v26, %v120_v20 }
 0x111   :  { %606 = vmatpush.xpose.msk.msra.mxu2 %vm90_vm2, %v142_v28 }
 0x114   :  { %607 = vmatmul.msk.f32.vlgmr.msra.gmra.mxu2 %vm90_vm2, %v118_v29 }
 0x116   :  { %v162_v31 = vpop.f32.mrf.mxu3 }
 0x117   :  { %v163_v32 = vadd.f32 %v162_v31, %v144_v30 }
 0x119   :  { %228 = vmatpush.msrb.mxu1 %v163_v32  ;;  %v389_v32 = vld [vmem:[%s910_s3 + $0x18] sm:$0xff] }
 0x11b   :  { %410 = vmatpush.msra.mxu1 %v389_v32 }
 0x11e   :  { %v165_v33 = vpop.f32.mrf.mxu3 }
 0x11f   :  { %v166_v34 = vadd.f32 %v165_v33, %v144_v30  ;;  %v388_v33 = vld [vmem:[%s910_s3 + $0x10] sm:$0xff] }
 0x120   :  { %411 = vmatpush.msra.mxu1 %v388_v33 }
 0x121   :  { %292 = vmatpush.msra.mxu3 %v166_v34  ;;  %v387_v34 = vld [vmem:[%s910_s3 + $0x8] sm:$0xff] }
 0x122   :  { %412 = vmatpush.msra.mxu1 %v387_v34 }
 0x183   :  { %v191_v35 = vpop.f32.mrf.mxu0 }
 0x184   :  { %v194_v36 = vmul.f32 0.17677669, %v191_v35  ;;  %v386_v35 = vld [vmem:[%s910_s3] sm:$0xff] }
 0x185   :  { %413 = vmatpush.msra.mxu1 %v386_v35 }
 0x186   :  { %v196_v37 = vsel %vm195_vm3, %v194_v36, -inf }
 0x187   :  { %197 = vmax.xlane.f32.xlu0 %v196_v37 }
 0x197   :  { %v256_v38 = vpop.f32.mrf.mxu2 }
 0x198   :  { %v259_v39 = vmul.f32 0.17677669, %v256_v38 }
 0x19a   :  { %v260_v40 = vsel %vm195_vm3, %v259_v39, -inf }
 0x19b   :  { %261 = vmax.xlane.f32.xlu0 %v260_v40 }
 0x1fa   :  { %v198_v41 = vpop.xlane.xlu0 %197 }
 0x1fb   :  { %v199_v42 = vsub.f32 %v194_v36, %v198_v41 }
 0x1fd   :  { %v200_v43 = vmul.f32 1.442695, %v199_v42 }
 0x1ff   :  { %626 = vpow2.f32 %v200_v43 }
 0x205   :  { %v627_v44 = vpop.eup %626 }
 0x206   :  { %v202_v45 = vsel %vm195_vm3, %v627_v44, 0.0 }
 0x207   :  { %203 = vadd.xlane.f32.xlu1 %v202_v45  ;;  %v828_v45 = vld [vmem:[%s908_s1 + $0x8] sm:$0x3f] }
 0x20e   :  { %v262_v46 = vpop.xlane.xlu0 %261 }
 0x20f   :  { %v263_v47 = vsub.f32 %v259_v39, %v262_v46  ;;  %v380_v46 = vperm.slane %v708_v0, 7 }
 0x211   :  { %v264_v48 = vmul.f32 1.442695, %v263_v47 }
 0x213   :  { %628 = vpow2.f32 %v264_v48 }
 0x219   :  { %v629_v49 = vpop.eup %628 }
 0x21a   :  { %v266_v50 = vsel %vm195_vm3, %v629_v49, 0.0 }
 0x21b   :  { %267 = vadd.xlane.f32.xlu1 %v266_v50  ;;  %v88_v50 = vld [vmem:[%s909_s2 + $0xf8] sm:$0xff] }
 0x21c   :  { %424 = vmatpush.msrb.mxu2 %v88_v50 }
 0x27a   :  { %v204_v51 = vpop.xlane.xlu1 %203 }
 0x27b   :  { %630 = vrcp.f32 %v204_v51 }
 0x281   :  { %v631_v55 = vpop.eup %630 }
 0x282   :  { %v206_v56 = vmul.f32 %v631_v55, %v204_v51  ;;  %v87_v51 = vld [vmem:[%s909_s2 + $0xf0] sm:$0xff] }
 0x283   :  { %425 = vmatpush.msrb.mxu2 %v87_v51 }
 0x284   :  { %v207_v57 = vsub.f32 2.0, %v206_v56  ;;  %v85_v56 = vld [vmem:[%s909_s2 + $0xe0] sm:$0xff] }
 0x285   :  { %426 = vmatpush.msrb.mxu2 %v86_v53 }
 0x286   :  { %v208_v58 = vmul.f32 %v631_v55, %v207_v57 }
 0x287   :  { %427 = vmatpush.msrb.mxu2 %v85_v56  ;;  %v493_v56 = vperm.slane %v828_v45, 1 }
 0x288   :  { %v209_v59 = vmul.f32 %v627_v44, %v208_v58  ;;  %v84_v58 = vld [vmem:[%s909_s2 + $0xd8] sm:$0xff] }
 0x289   :  { %428 = vmatpush.msrb.mxu2 %v84_v58 }
 0x28a   :  { %605 = vmatmul.msk.f32.vlgmr.msrb.gmra.mxu1 %vm195_vm3, %v209_v59  ;;  %v83_v59 = vld [vmem:[%s909_s2 + $0xd0] sm:$0xff] }
 0x28b   :  { %429 = vmatpush.msrb.mxu2 %v83_v59  ;;  %v496_v59 = vperm.slane %v828_v45, 2 }
 0x28e   :  { %v268_v60 = vpop.xlane.xlu1 %267 }
 0x28f   :  { %632 = vrcp.f32 %v268_v60 }
 0x290   :  { %634 = vrcp.f32 %v676_v15  ;;  %v74_v15 = vld [vmem:[%s909_s2 + $0x88] sm:$0xff] }
 0x295   :  { %v633_v61 = vpop.eup %632 }
 0x296   :  { %v270_v62 = vmul.f32 %v633_v61, %v268_v60  ;;  %v635_v16 = vpop.eup %634  ;;  %v82_v60 = vld [vmem:[%s909_s2 + $0xc8] sm:$0xff] }
 0x297   :  { %v336_v18 = vmul.f32 32.0, %v635_v16  ;;  %vm340_vm4 = vweird.f32 %v635_v16  ;;  %430 = vmatpush.msrb.mxu2 %v82_v60 }
 0x298   :  { %v271_v63 = vsub.f32 2.0, %v270_v62 }
 0x299   :  { %v337_v20 = vsub.f32 1.0, %v336_v18  ;;  %v625_v18 = vld [vmem:[%s910_s3 + $0x20] ss:$0 sm:$0xff] }
 0x29a   :  { %v272_v1 = vmul.f32 %v633_v61, %v271_v63  ;;  %v81_v61 = vld [vmem:[%s909_s2 + $0xc0] sm:$0xff]  ;;  %v80_v63 = vld [vmem:[%s909_s2 + $0xb8] sm:$0xff] }
 0x29b   :  { %v338_v21 = vmul.f32 %v635_v16, %v337_v20  ;;  %431 = vmatpush.msrb.mxu2 %v81_v61 }
 0x29c   :  { %v273_v2 = vmul.f32 %v629_v49, %v272_v1  ;;  %v383_v49 = vperm.slane %v828_v45, 0 }
 0x29d   :  { %v339_v22 = vadd.f32 %v635_v16, %v338_v21  ;;  %432 = vmatpush.msrb.mxu2 %v80_v63 }
 0x29e   :  { %608 = vmatmul.msk.f32.vlgmr.msra.gmra.mxu3 %vm195_vm3, %v273_v2  ;;  %v79_v2 = vld [vmem:[%s909_s2 + $0xb0] sm:$0xff]  ;;  %vm529_vm3 = vcmask 1041409  }
 0x29f   :  { %v802_v23 = vsel %vm340_vm4, %v635_v16, %v339_v22  ;;  %433 = vmatpush.msrb.mxu2 %v79_v2  ;;  %v73_v16 = vld [vmem:[%s909_s2 + $0x80] sm:$0xff]  ;;  %v677_v2 = vmov 8.0  }
 0x307   :  { %v230_v4 = vpop.f32.mrf.mxu1 }
 0x308   :  { %609 = vmatmul.msk.f32.vlgmr.msrb.gmra.mxu0 %vm90_vm2, %v230_v4  ;;  %v78_v4 = vld [vmem:[%s909_s2 + $0xa8] sm:$0xff] }
 0x309   :  { %434 = vmatpush.msrb.mxu2 %v78_v4 }
 0x321   :  { %v294_v5 = vpop.f32.mrf.mxu3 }
 0x322   :  { %610 = vmatmul.msk.f32.gmra.mxu0 %vm90_vm2, %v294_v5 }
 0x385   :  { %v321_v7 = vpop.f32.mrf.mxu0 }
 0x386   :  { %v322_v8 = vadd.f32 %v321_v7, %v297_v6 }
 0x388   :  { %v327_v9 = vadd.f32 %v322_v8, %v754_v17  ;;  %v76_v8 = vld [vmem:[%s909_s2 + $0x98] sm:$0xff] }
 0x38a   :  { %v329_v10 = vsel %vm90_vm2, %v327_v9, 0.0 }
 0x38b   :  { %330 = vadd.xlane.f32.xlu2 %v329_v10 }
 0x39f   :  { %v324_v11 = vpop.f32.mrf.mxu0 }
 0x3a0   :  { %v325_v12 = vadd.f32 %v324_v11, %v297_v6  ;;  %v77_v6 = vld [vmem:[%s909_s2 + $0xa0] sm:$0xff] }
 0x3a1   :  { %435 = vmatpush.msrb.mxu2 %v77_v6 }
 0x3a2   :  { %v328_v13 = vadd.f32 %v325_v12, %v760_v19 }
 0x3a3   :  { %436 = vmatpush.msrb.mxu2 %v76_v8 }
 0x3a4   :  { %v332_v14 = vsel %vm90_vm2, %v328_v13, 0.0 }
 0x3a5   :  { %333 = vadd.xlane.f32.xlu2 %v332_v14  ;;  %v75_v14 = vld [vmem:[%s909_s2 + $0x90] sm:$0xff]  ;;  %s679_s2 = smov [#allocation2]  }
 0x3a6   :  { %437 = vmatpush.msrb.mxu2 %v75_v14  ;;  %s583_s3 = sshll.u32 %s679_s2, 4  ;;  %s584_s3 = int_to_ptr.vmem [resolvable:$true] %s583_s3 }
 0x3a8   :  { %438 = vmatpush.msrb.mxu2 %v74_v15 }
 0x3aa   :  { %439 = vmatpush.msrb.mxu2 %v73_v16 }
 0x3fe   :  { %v331_v17 = vpop.xlane.xlu2 %330 }
 0x3ff   :  { %v342_v24 = vmul.f32 %v802_v23, %v331_v17 }
 0x401   :  { %v344_v25 = vsub.f32 %v327_v9, %v342_v24 }
 0x403   :  { %v346_v26 = vmul.f32 %v344_v25, %v344_v25 }
 0x405   :  { %v348_v19 = vsel %vm90_vm2, %v346_v26, 0.0  ;;  %v423_v26 = vperm.slane %v828_v45, 3 }
 0x406   :  { %349 = vadd.xlane.f32.xlu0 %v348_v19 }
 0x418   :  { %v334_v27 = vpop.xlane.xlu2 %333 }
 0x419   :  { %v343_v28 = vmul.f32 %v802_v23, %v334_v27 }
 0x41b   :  { %v807_v29 = vsub.f32 %v328_v13, %v343_v28 }
 0x41d   :  { %v347_v30 = vmul.f32 %v807_v29, %v807_v29 }
 0x41f   :  { %v351_v31 = vsel %vm90_vm2, %v347_v30, 0.0 }
 0x420   :  { %352 = vadd.xlane.f32.xlu1 %v351_v31 }
 0x479   :  { %v350_v36 = vpop.xlane.xlu0 %349 }
 0x47a   :  { %v354_v37 = vmul.f32 %v350_v36, %v802_v23 }
 0x47c   :  { %v356_v38 = vadd.f32 1e-05, %v354_v37 }
 0x47e   :  { %636 = vrsqrt.f32 %v356_v38  ;;  %vm364_vm6 = vweird.f32 %v356_v38 }
 0x484   :  { %v637_v39 = vpop.eup %636 }
 0x485   :  { %v359_v40 = vmul.f32 %v637_v39, %v356_v38  ;;  %vm365_vm5 = vweird.f32 %v637_v39 }
 0x486   :  { %vm366_vm7 = vmor %vm364_vm6, %vm365_vm5  ;;  %vm576_vm6 = vcmask 8192  }
 0x487   :  { %v360_v41 = vmul.f32 %v637_v39, %v359_v40 }
 0x489   :  { %v361_v42 = vmul.f32 0.5, %v360_v41 }
 0x48b   :  { %v362_v43 = vsub.f32 1.5, %v361_v42 }
 0x48d   :  { %v363_v44 = vmul.f32 %v637_v39, %v362_v43 }
 0x48f   :  { %v367_v47 = vsel %vm366_vm7, %v637_v39, %v363_v44 }
 0x490   :  { %v378_v48 = vmul.f32 %v367_v47, %v344_v25 }
 0x492   :  { %v381_v52 = vmul.f32 %v380_v46, %v378_v48 }
 0x493   :  { %v353_v0 = vpop.xlane.xlu1 %352 }
 0x494   :  { %v355_v54 = vmul.f32 %v353_v0, %v802_v23  ;;  %v384_v55 = vadd.f32 %v383_v49, %v381_v52 }
 0x496   :  { %v357_v57 = vadd.f32 1e-05, %v355_v54  ;;  %611 = vmatmul.msk.f32.vlgmr.msra.gmra.mxu1 %vm90_vm2, %v384_v55 }
 0x498   :  { %638 = vrsqrt.f32 %v357_v57  ;;  %vm374_vm9 = vweird.f32 %v357_v57 }
 0x49e   :  { %v639_v62 = vpop.eup %638 }
 0x49f   :  { %v369_v1 = vmul.f32 %v639_v62, %v357_v57  ;;  %vm375_vm8 = vweird.f32 %v639_v62 }
 0x4a0   :  { %vm376_vm10 = vmor %vm374_vm9, %vm375_vm8 }
 0x4a1   :  { %v370_v3 = vmul.f32 %v639_v62, %v369_v1 }
 0x4a3   :  { %v371_v5 = vmul.f32 0.5, %v370_v3 }
 0x4a5   :  { %v372_v7 = vsub.f32 1.5, %v371_v5  ;;  %v678_v5 = vmov 0  }
 0x4a6   :  { %624 = vset.pattern.permute.xlu0 %v678_v5 }
 0x4a7   :  { %v373_v9 = vmul.f32 %v639_v62, %v372_v7 }
 0x4a9   :  { %v377_v10 = vsel %vm376_vm10, %v639_v62, %v373_v9 }
 0x4aa   :  { %v379_v11 = vmul.f32 %v377_v10, %v807_v29 }
 0x4ac   :  { %v382_v12 = vmul.f32 %v380_v46, %v379_v11 }
 0x4ae   :  { %v385_v13 = vadd.f32 %v383_v49, %v382_v12 }
 0x4b0   :  { %612 = vmatmul.msk.f32.gmra.mxu1 %vm90_vm2, %v385_v13 }
 0x513   :  { %v415_v20 = vpop.f32.mrf.mxu1 }
 0x514   :  { %v416_v21 = vadd.f32 %v625_v18, %v415_v20 }
 0x516   :  { %v421_v22 = vmax.f32 %v416_v21, 0.0 }
 0x518   :  { %440 = vmatmul.f32.vlgmr.msrb.gmra.mxu2 %v421_v22 }
 0x52d   :  { %v418_v17 = vpop.f32.mrf.mxu1 }
 0x52e   :  { %v419_v24 = vadd.f32 %v625_v18, %v418_v17 }
 0x530   :  { %v422_v25 = vmax.f32 %v419_v24, 0.0 }
 0x532   :  { %443 = vmatmul.f32.gmra.mxu2 %v422_v25 }
 0x59b   :  { %v441_v19 = vpop.f32.mrf.mxu2 }
 0x59c   :  { %v442_v27 = vadd.f32 %v441_v19, %v423_v26 }
 0x59e   :  { %v447_v28 = vadd.f32 %v442_v27, %v384_v55 }
 0x5a0   :  { %v449_v29 = vsel %vm90_vm2, %v447_v28, 0.0 }
 0x5a1   :  { %450 = vadd.xlane.f32.xlu2 %v449_v29 }
 0x5b5   :  { %v444_v30 = vpop.f32.mrf.mxu2 }
 0x5b6   :  { %v445_v31 = vadd.f32 %v444_v30, %v423_v26 }
 0x5b8   :  { %v448_v32 = vadd.f32 %v445_v31, %v385_v13 }
 0x5ba   :  { %v452_v33 = vsel %vm90_vm2, %v448_v32, 0.0 }
 0x5bb   :  { %453 = vadd.xlane.f32.xlu0 %v452_v33 }
 0x5cf   :  { %524 = vperm.xlu0 %624, %v828_v45  }
 0x614   :  { %v451_v34 = vpop.xlane.xlu2 %450 }
 0x615   :  { %v455_v35 = vmul.f32 %v451_v34, %v802_v23  ;;  %v526_v34 = vrot.slane %v828_v45, 4 }
 0x617   :  { %v457_v36 = vsub.f32 %v447_v28, %v455_v35 }
 0x619   :  { %v459_v37 = vmul.f32 %v457_v36, %v457_v36 }
 0x61b   :  { %v461_v38 = vsel %vm90_vm2, %v459_v37, 0.0 }
 0x61c   :  { %462 = vadd.xlane.f32.xlu1 %v461_v38 }
 0x62e   :  { %v454_v39 = vpop.xlane.xlu0 %453 }
 0x62f   :  { %v456_v40 = vmul.f32 %v454_v39, %v802_v23 }
 0x631   :  { %v458_v41 = vsub.f32 %v448_v32, %v456_v40 }
 0x633   :  { %v460_v42 = vmul.f32 %v458_v41, %v458_v41 }
 0x635   :  { %v464_v43 = vsel %vm90_vm2, %v460_v42, 0.0 }
 0x636   :  { %465 = vadd.xlane.f32.xlu2 %v464_v43 }
 0x641   :  { %v525_v35 = vpop.permute.xlu0 %524 }
 0x68f   :  { %v463_v44 = vpop.xlane.xlu1 %462 }
 0x690   :  { %v467_v46 = vmul.f32 %v463_v44, %v802_v23 }
 0x692   :  { %v469_v47 = vadd.f32 1e-05, %v467_v46 }
 0x694   :  { %640 = vrsqrt.f32 %v469_v47  ;;  %vm477_vm12 = vweird.f32 %v469_v47 }
 0x69a   :  { %v641_v48 = vpop.eup %640 }
 0x69b   :  { %v472_v49 = vmul.f32 %v641_v48, %v469_v47  ;;  %vm478_vm11 = vweird.f32 %v641_v48 }
 0x69c   :  { %vm479_vm13 = vmor %vm477_vm12, %vm478_vm11 }
 0x69d   :  { %v473_v50 = vmul.f32 %v641_v48, %v472_v49 }
 0x69f   :  { %v474_v51 = vmul.f32 0.5, %v473_v50 }
 0x6a1   :  { %v475_v52 = vsub.f32 1.5, %v474_v51 }
 0x6a3   :  { %v476_v53 = vmul.f32 %v641_v48, %v475_v52 }
 0x6a5   :  { %v480_v0 = vsel %vm479_vm13, %v641_v48, %v476_v53 }
 0x6a6   :  { %v491_v57 = vmul.f32 %v480_v0, %v457_v36  ;;  %v531_v36 = vrot.slane %v525_v35, 5 }
 0x6a8   :  { %v494_v60 = vmul.f32 %v493_v56, %v491_v57 }
 0x6a9   :  { %v466_v54 = vpop.xlane.xlu2 %465 }
 0x6aa   :  { %v468_v55 = vmul.f32 %v466_v54, %v802_v23  ;;  %v497_v62 = vadd.f32 %v496_v59, %v494_v60 }
 0x6ac   :  { %v470_v58 = vadd.f32 1e-05, %v468_v55  ;;  %v499_v3 = vsel %vm90_vm2, %v497_v62, 0.0 }
 0x6ad   :  { %v500_v23 = vrot.slane %v499_v3, 4 }
 0x6ae   :  { %642 = vrsqrt.f32 %v470_v58  ;;  %vm487_vm15 = vweird.f32 %v470_v58 }
 0x6af   :  { %644 = vrcp.f32 %v677_v2  ;;  %v501_v10 = vadd.f32 %v500_v23, %v499_v3 }
 0x6b1   :  { %v502_v14 = vrot.slane %v501_v10, 2 }
 0x6b3   :  { %v503_v21 = vadd.f32 %v502_v14, %v501_v10 }
 0x6b4   :  { %v643_v61 = vpop.eup %642 }
 0x6b5   :  { %v482_v63 = vmul.f32 %v643_v61, %v470_v58  ;;  %vm488_vm14 = vweird.f32 %v643_v61  ;;  %v645_v7 = vpop.eup %644  ;;  %v504_v24 = vrot.slane %v503_v21, 1 }
 0x6b6   :  { %vm489_vm0 = vmor %vm487_vm15, %vm488_vm14  ;;  %v514_v12 = vmul.f32 8.0, %v645_v7  ;;  %vm518_vm1 = vweird.f32 %v645_v7 }
 0x6b7   :  { %v483_v1 = vmul.f32 %v643_v61, %v482_v63  ;;  %v505_v27 = vadd.f32 %v504_v24, %v503_v21 }
 0x6b8   :  { %v515_v16 = vsub.f32 1.0, %v514_v12 }
 0x6b9   :  { %v484_v4 = vmul.f32 0.5, %v483_v1 }
 0x6ba   :  { %v516_v22 = vmul.f32 %v645_v7, %v515_v16 }
 0x6bb   :  { %v485_v6 = vsub.f32 1.5, %v484_v4 }
 0x6bc   :  { %v517_v26 = vadd.f32 %v645_v7, %v516_v22 }
 0x6bd   :  { %v486_v8 = vmul.f32 %v643_v61, %v485_v6 }
 0x6be   :  { %v519_v29 = vsel %vm518_vm1, %v645_v7, %v517_v26 }
 0x6bf   :  { %v490_v9 = vsel %vm489_vm0, %v643_v61, %v486_v8  ;;  %v520_v31 = vmul.f32 %v519_v29, %v505_v27 }
 0x6c0   :  { %v492_v11 = vmul.f32 %v490_v9, %v458_v41 }
 0x6c2   :  { %v495_v13 = vmul.f32 %v493_v56, %v492_v11 }
 0x6c4   :  { %v498_v15 = vadd.f32 %v496_v59, %v495_v13 }
 0x6c6   :  { %v506_v18 = vsel %vm90_vm2, %v498_v15, 0.0 }
 0x6c7   :  { %v507_v20 = vrot.slane %v506_v18, 4 }
 0x6c9   :  { %v508_v17 = vadd.f32 %v507_v20, %v506_v18 }
 0x6cb   :  { %v509_v25 = vrot.slane %v508_v17, 2 }
 0x6cd   :  { %v510_v19 = vadd.f32 %v509_v25, %v508_v17 }
 0x6cf   :  { %v511_v28 = vrot.slane %v510_v19, 1 }
 0x6d1   :  { %v512_v30 = vadd.f32 %v511_v28, %v510_v19 }
 0x6d3   :  { %v521_v32 = vmul.f32 %v519_v29, %v512_v30 }
 0x6d5   :  { %v530_v33 = vsel %vm529_vm3, %v521_v32, %v520_v31 }
 0x6d6   :  { %613 = vmatpush.xpose.msk.msrb.mxu3 %vm90_vm2, %v530_v33 }
 0x6d9   :  { %614 = vmatmul.msk.f32.vlgmr.msrb.gmra.mxu3 %vm90_vm2, %v526_v34 }
 0x75c   :  { %v554_v37 = vpop.f32.mrf.mxu3 }
 0x75d   :  { %v555_v38 = vadd.f32 %v554_v37, %v531_v36 }
 0x75f   :  { %v615_v39 = vmul.f32 -1.442695, %v555_v38 }
 0x761   :  { %646 = vpow2.f32 %v615_v39 }
 0x767   :  { %v647_v40 = vpop.eup %646 }
 0x768   :  { %v560_v41 = vadd.f32 1.0, %v647_v40 }
 0x76a   :  { %648 = vrcp.f32 %v560_v41  ;;  %v572_v46 = vand.u32 2147483648, %v560_v41  ;;  %v570_v45 = vand.u32 2147483647, %v560_v41  ;;  %vm566_vm2 = vweird.f32 %v560_v41 }
 0x76c   :  { %v573_v49 = vor.u32 1.1754944e-38, %v572_v46  ;;  %vm571_vm7 = vcmp.eq.f32.partialorder %v570_v45, 8.507059e+37 }
 0x770   :  { %v649_v42 = vpop.eup %648 }
 0x771   :  { %v562_v43 = vmul.f32 %v649_v42, %v560_v41  ;;  %vm567_vm4 = vweird.f32 %v649_v42 }
 0x772   :  { %vm568_vm5 = vmor %vm566_vm2, %vm567_vm4 }
 0x773   :  { %v563_v44 = vsub.f32 1.0, %v562_v43 }
 0x775   :  { %v564_v47 = vmul.f32 %v649_v42, %v563_v44 }
 0x777   :  { %v565_v48 = vadd.f32 %v649_v42, %v564_v47 }
 0x779   :  { %v569_v50 = vsel %vm568_vm5, %v649_v42, %v565_v48 }
 0x77a   :  { %v574_v51 = vsel %vm571_vm7, %v573_v49, %v569_v50 }
 0x77b   :  { %577 = vst.msk [vmem:[#allocation2] sm:$0x1] %vm576_vm6, %v574_v51 }
 0x77c   :  { %588 = dma.vmem_to_hbm [thread:$0]  %s584_s3, 16, %s586_s16, [#allocation3]  }
 0x77d   :  { %674 = dma.done.wait [#allocation3], 16  }
 0x77e   :  { %675 = vsyncadd [#allocation3], 4294967280 }
 0x77f   :  { %593 = vsyncpa [#allocation3], 1 }

</bundles_post_ra>
